<compile_context>
chip_gen: v7x
topology: tpu7x:2x2x1
jax: 0.10.0
libtpu: 0.0.40
codegen_flags: <defaults>
</compile_context>

<pallas_src>
import functools

import jax
import jax.numpy as jnp
from jax import lax
from jax.experimental import pallas as pl
from jax.experimental.pallas import tpu as pltpu


def _residual_block_kernel(x_ref, mask_ref, w1_ref, w2_ref, out_ref, *,
                           height, width):
    """Fused conv3x3 -> ReLU -> conv3x3 -> +x for a block of Nb images.

    x_ref:    (1, Nb*C, L)     W-padded, flattened, halo'd images; L = H*Wp + 2*(Wp+1)
    mask_ref: (1, H*Wp)        1.0 on interior columns, 0.0 on the two W-pad columns
    w1_ref:   (Nb*C, 9*Nb*C)   tap-major block-diagonal im2col conv1 weights
    w2_ref:   (Nb*C, 9*Nb*C)   tap-major block-diagonal im2col conv2 weights
    out_ref:  (1, Nb*C, H*Wp)  x + conv2(relu(conv1(x)))   (padded-width layout)
    """
    wp = width + 2
    hwp = height * wp
    halo = wp + 1

    x = x_ref[0]                 # (Nb*C, L) float32
    mask = mask_ref[...]         # (1, H*Wp) float32

    def tap_slices(buf):
        # Tap (dh, dw) of the flat halo'd image(s): a static lane-offset slice.
        return [buf[:, dh * wp + dw: dh * wp + dw + hwp]
                for dh in range(3) for dw in range(3)]

    t1 = tap_slices(x)
    x_int = t1[4]                # centre tap == un-halo'd padded image (the residual)

    # conv1: single im2col MXU matmul, f32 accumulation.
    y1 = jnp.dot(w1_ref[...], jnp.concatenate(t1, axis=0),
                 preferred_element_type=jnp.float32)
    # ReLU, then zero the two W-padding columns so conv2 sees 'SAME' zero padding.
    y1 = jnp.maximum(y1, 0.0) * mask

    # conv2 on y1: re-attach the flat zero halo, then the same 9 static tap slices.
    zpad = jnp.zeros((y1.shape[0], halo), jnp.float32)
    t2 = tap_slices(jnp.concatenate([zpad, y1, zpad], axis=1))
    y2 = jnp.dot(w2_ref[...], jnp.concatenate(t2, axis=0),
                 preferred_element_type=jnp.float32)

    out_ref[0] = (x_int + y2).astype(out_ref.dtype)


def _prep_weight(w_oihw, nb):
    """(O, I, 3, 3) -> tap-major block-diagonal (nb*C, 9*nb*C) im2col weight.

    Column layout matches the in-kernel tap matrix: column t*nb*C + b*C + i holds the
    weight for tap t = dh*3 + dw, image-in-block b, input channel i.
    """
    c = w_oihw.shape[0]
    w_t = jnp.transpose(w_oihw, (2, 3, 0, 1)).reshape(9, c, c)   # [t][o, i]
    eye = jnp.eye(nb, dtype=w_t.dtype)
    return jnp.concatenate([jnp.kron(eye, w_t[t]) for t in range(9)], axis=1)


def residual_block_pallas(x_nchw, w1_oihw, w2_oihw, *, images_per_block=None):
    """Forward pass of ResidualBlock (dropRate = 0.0)."""
    n, c, h, w = x_nchw.shape
    wp = w + 2
    hwp = h * wp
    halo = wp + 1
    lbuf = hwp + 2 * halo
    out_dtype = x_nchw.dtype

    if images_per_block is None:
        # Fill the 8 f32 sublanes (nb*c >= 8) when the batch allows.
        # NOTE(v7x): with a very small batch you may prefer images_per_block=1 so the
        # 'parallel' grid axis keeps >= 2 steps and both TensorCores get work; for
        # n >= 4 this heuristic already leaves >= 2 parallel grid steps.
        nb = min(n, max(1, 8 // c))
        while n % nb:
            nb -= 1
    else:
        nb = images_per_block
    assert n % nb == 0, "images_per_block must divide the batch size"
    nbc = nb * c
    steps = n // nb

    # Wrapper-side layout prep (tiny, done once by XLA outside the kernel):
    #   * zero-pad only W (W -> Wp) so conv taps never wrap across rows,
    #   * flatten (H, Wp) onto the lane axis,
    #   * add a flat halo of Wp+1 zero lanes per side so the dh=0 / dh=2 taps of the
    #     top / bottom image rows read zeros,
    #   * group nb images onto the sublane axis.
    xf = jnp.pad(x_nchw.astype(jnp.float32), ((0, 0), (0, 0), (0, 0), (1, 1)))
    xf = jnp.pad(xf.reshape(n * c, hwp), ((0, 0), (halo, halo)))
    xf = xf.reshape(steps, nbc, lbuf)

    # Interior-column mask (1 on real image columns, 0 on the two pad columns).
    col = jnp.arange(hwp, dtype=jnp.int32) % wp
    mask = ((col >= 1) & (col <= w)).astype(jnp.float32).reshape(1, hwp)

    w1m = _prep_weight(w1_oihw.astype(jnp.float32), nb)   # (nbc, 9*nbc): one f32 tile
    w2m = _prep_weight(w2_oihw.astype(jnp.float32), nb)

    kernel = functools.partial(_residual_block_kernel, height=h, width=w)

    out = pl.pallas_call(
        kernel,
        out_shape=jax.ShapeDtypeStruct((steps, nbc, hwp), out_dtype),
        grid=(steps,),
        in_specs=[
            pl.BlockSpec((1, nbc, lbuf), lambda i: (i, 0, 0)),
            pl.BlockSpec((1, hwp), lambda i: (0, 0)),
            pl.BlockSpec((nbc, 9 * nbc), lambda i: (0, 0)),
            pl.BlockSpec((nbc, 9 * nbc), lambda i: (0, 0)),
        ],
        out_specs=pl.BlockSpec((1, nbc, hwp), lambda i: (i, 0, 0)),
        compiler_params=pltpu.CompilerParams(
            dimension_semantics=("parallel",)),
    )(xf, mask, w1m, w2m)

    # Drop the two zero-padding columns and restore NCHW.
    return out.reshape(n, c, h, wp)[:, :, :, 1:w + 1]


def _reference_forward(x_nchw, w1_oihw, w2_oihw):
    dn = ("NCHW", "OIHW", "NCHW")
    y1 = jax.nn.relu(lax.conv_general_dilated(
        x_nchw, w1_oihw, (1, 1), "SAME", dimension_numbers=dn))
    y2 = lax.conv_general_dilated(
        y1, w2_oihw, (1, 1), "SAME", dimension_numbers=dn)
    return x_nchw + y2


if __name__ == "__main__":
    N, C, H, W = 2, 4, 16, 16  # in_planes = 4

    key = jax.random.PRNGKey(0)
    kx, k1, k2 = jax.random.split(key, 3)

    x = jax.random.normal(kx, (N, C, H, W), dtype=jnp.float32)
    # Deterministic conv weights, PyTorch-like fan-in scaling (bias=False).
    fan_in = C * 3 * 3
    scale = 1.0 / float(fan_in) ** 0.5
    w1 = jax.random.uniform(k1, (C, C, 3, 3), jnp.float32, -scale, scale)
    w2 = jax.random.uniform(k2, (C, C, 3, 3), jnp.float32, -scale, scale)

    out = residual_block_pallas(x, w1, w2)
    out = jax.block_until_ready(out)

    ref = _reference_forward(x, w1, w2)
    assert out.shape == ref.shape == (N, C, H, W)
    assert jnp.allclose(out, ref, atol=1e-3, rtol=1e-3), "mismatch vs reference"

    print("KERNEL_OK")
</pallas_src>

<mosaic_0001>
module attributes {stable_mosaic.version = 11 : i64} {
  func.func @_residual_block_kernel(%arg0: i32, %arg1: memref<1x8x326xf32, #tpu.memory_space<vmem>>, %arg2: memref<1x288xf32, #tpu.memory_space<vmem>>, %arg3: memref<8x72xf32, #tpu.memory_space<vmem>>, %arg4: memref<8x72xf32, #tpu.memory_space<vmem>>, %arg5: memref<1x8x288xf32, #tpu.memory_space<vmem>>) attributes {dimension_semantics = [#tpu.dimension_semantics<parallel>], iteration_bounds = array<i64: 1>, scalar_prefetch = 0 : i64, scratch_operands = 0 : i64, tpu.core_type = #tpu.core_type<tc>, window_params = [{transform_indices = @transform_0, window_bounds = array<i64: 1, 8, 326>}, {pipeline_mode = #tpu.pipeline_mode<synchronous>, transform_indices = @transform_1, window_bounds = array<i64: 1, 288>}, {pipeline_mode = #tpu.pipeline_mode<synchronous>, transform_indices = @transform_2, window_bounds = array<i64: 8, 72>}, {pipeline_mode = #tpu.pipeline_mode<synchronous>, transform_indices = @transform_3, window_bounds = array<i64: 8, 72>}, {transform_indices = @transform_4, window_bounds = array<i64: 1, 8, 288>}]} {
    %c0 = arith.constant 0 : index
    %c0_0 = arith.constant 0 : index
    %c0_1 = arith.constant 0 : index
    %0 = vector.load %arg1[%c0, %c0_0, %c0_1] : memref<1x8x326xf32, #tpu.memory_space<vmem>>, vector<1x8x326xf32>
    %1 = vector.shape_cast %0 : vector<1x8x326xf32> to vector<8x326xf32>
    %c0_2 = arith.constant 0 : index
    %c0_3 = arith.constant 0 : index
    %2 = vector.load %arg2[%c0_2, %c0_3] : memref<1x288xf32, #tpu.memory_space<vmem>>, vector<1x288xf32>
    %3 = vector.extract_strided_slice %1 {offsets = [0, 0], sizes = [8, 288], strides = [1, 1]} : vector<8x326xf32> to vector<8x288xf32>
    %4 = vector.extract_strided_slice %1 {offsets = [0, 1], sizes = [8, 288], strides = [1, 1]} : vector<8x326xf32> to vector<8x288xf32>
    %5 = vector.extract_strided_slice %1 {offsets = [0, 2], sizes = [8, 288], strides = [1, 1]} : vector<8x326xf32> to vector<8x288xf32>
    %6 = vector.extract_strided_slice %1 {offsets = [0, 18], sizes = [8, 288], strides = [1, 1]} : vector<8x326xf32> to vector<8x288xf32>
    %7 = vector.extract_strided_slice %1 {offsets = [0, 19], sizes = [8, 288], strides = [1, 1]} : vector<8x326xf32> to vector<8x288xf32>
    %8 = vector.extract_strided_slice %1 {offsets = [0, 20], sizes = [8, 288], strides = [1, 1]} : vector<8x326xf32> to vector<8x288xf32>
    %9 = vector.extract_strided_slice %1 {offsets = [0, 36], sizes = [8, 288], strides = [1, 1]} : vector<8x326xf32> to vector<8x288xf32>
    %10 = vector.extract_strided_slice %1 {offsets = [0, 37], sizes = [8, 288], strides = [1, 1]} : vector<8x326xf32> to vector<8x288xf32>
    %11 = vector.extract_strided_slice %1 {offsets = [0, 38], sizes = [8, 288], strides = [1, 1]} : vector<8x326xf32> to vector<8x288xf32>
    %c0_4 = arith.constant 0 : index
    %c0_5 = arith.constant 0 : index
    %12 = vector.load %arg3[%c0_4, %c0_5] : memref<8x72xf32, #tpu.memory_space<vmem>>, vector<8x72xf32>
    %13 = tpu.concatenate %3, %4, %5, %6, %7, %8, %9, %10, %11 in 0 : vector<8x288xf32>, vector<8x288xf32>, vector<8x288xf32>, vector<8x288xf32>, vector<8x288xf32>, vector<8x288xf32>, vector<8x288xf32>, vector<8x288xf32>, vector<8x288xf32> -> vector<72x288xf32>
    %cst = arith.constant dense<0.000000e+00> : vector<8x288xf32>
    %14 = tpu.matmul %12, %13, %cst {dimension_numbers = #tpu.dot_dimension_numbers<[1], [0], [0], [1], [0, 0, 1, 1], [], []>} : vector<8x72xf32>, vector<72x288xf32>, vector<8x288xf32> -> vector<8x288xf32>
    %cst_6 = arith.constant 0.000000e+00 : f32
    %15 = vector.broadcast %cst_6 : f32 to vector<8x288xf32>
    %16 = arith.maximumf %14, %15 : vector<8x288xf32>
    %17 = vector.broadcast %2 : vector<1x288xf32> to vector<8x288xf32>
    %18 = arith.mulf %16, %17 : vector<8x288xf32>
    %cst_7 = arith.constant 0.000000e+00 : f32
    %19 = vector.broadcast %cst_7 : f32 to vector<8x19xf32>
    %20 = tpu.concatenate %19, %18, %19 in 1 : vector<8x19xf32>, vector<8x288xf32>, vector<8x19xf32> -> vector<8x326xf32>
    %21 = vector.extract_strided_slice %20 {offsets = [0, 0], sizes = [8, 288], strides = [1, 1]} : vector<8x326xf32> to vector<8x288xf32>
    %22 = vector.extract_strided_slice %20 {offsets = [0, 1], sizes = [8, 288], strides = [1, 1]} : vector<8x326xf32> to vector<8x288xf32>
    %23 = vector.extract_strided_slice %20 {offsets = [0, 2], sizes = [8, 288], strides = [1, 1]} : vector<8x326xf32> to vector<8x288xf32>
    %24 = vector.extract_strided_slice %20 {offsets = [0, 18], sizes = [8, 288], strides = [1, 1]} : vector<8x326xf32> to vector<8x288xf32>
    %25 = vector.extract_strided_slice %20 {offsets = [0, 19], sizes = [8, 288], strides = [1, 1]} : vector<8x326xf32> to vector<8x288xf32>
    %26 = vector.extract_strided_slice %20 {offsets = [0, 20], sizes = [8, 288], strides = [1, 1]} : vector<8x326xf32> to vector<8x288xf32>
    %27 = vector.extract_strided_slice %20 {offsets = [0, 36], sizes = [8, 288], strides = [1, 1]} : vector<8x326xf32> to vector<8x288xf32>
    %28 = vector.extract_strided_slice %20 {offsets = [0, 37], sizes = [8, 288], strides = [1, 1]} : vector<8x326xf32> to vector<8x288xf32>
    %29 = vector.extract_strided_slice %20 {offsets = [0, 38], sizes = [8, 288], strides = [1, 1]} : vector<8x326xf32> to vector<8x288xf32>
    %c0_8 = arith.constant 0 : index
    %c0_9 = arith.constant 0 : index
    %30 = vector.load %arg4[%c0_8, %c0_9] : memref<8x72xf32, #tpu.memory_space<vmem>>, vector<8x72xf32>
    %31 = tpu.concatenate %21, %22, %23, %24, %25, %26, %27, %28, %29 in 0 : vector<8x288xf32>, vector<8x288xf32>, vector<8x288xf32>, vector<8x288xf32>, vector<8x288xf32>, vector<8x288xf32>, vector<8x288xf32>, vector<8x288xf32>, vector<8x288xf32> -> vector<72x288xf32>
    %cst_10 = arith.constant dense<0.000000e+00> : vector<8x288xf32>
    %32 = tpu.matmul %30, %31, %cst_10 {dimension_numbers = #tpu.dot_dimension_numbers<[1], [0], [0], [1], [0, 0, 1, 1], [], []>} : vector<8x72xf32>, vector<72x288xf32>, vector<8x288xf32> -> vector<8x288xf32>
    %33 = arith.addf %7, %32 : vector<8x288xf32>
    %c0_11 = arith.constant 0 : index
    %c0_12 = arith.constant 0 : index
    %c0_13 = arith.constant 0 : index
    %34 = vector.load %arg5[%c0_11, %c0_12, %c0_13] : memref<1x8x288xf32, #tpu.memory_space<vmem>>, vector<1x8x288xf32>
    %35 = vector.shape_cast %34 : vector<1x8x288xf32> to vector<8x288xf32>
    %36 = vector.shape_cast %33 : vector<8x288xf32> to vector<1x8x288xf32>
    tpu.vector_store %arg5[%c0_11, %c0_12, %c0_13], %36 {strides = array<i32>} : memref<1x8x288xf32, #tpu.memory_space<vmem>>, vector<1x8x288xf32>,
    return
  }
  func.func @transform_0(%arg0: i32) -> (i32, i32, i32) {
    %c0_i32 = arith.constant 0 : i32
    %c0_i32_0 = arith.constant 0 : i32
    %c0_i32_1 = arith.constant 0 : i32
    return %arg0, %c0_i32, %c0_i32_0 : i32, i32, i32
  }
  func.func @transform_1(%arg0: i32) -> (i32, i32) {
    %c0_i32 = arith.constant 0 : i32
    %c0_i32_0 = arith.constant 0 : i32
    %c0_i32_1 = arith.constant 0 : i32
    return %c0_i32, %c0_i32_0 : i32, i32
  }
  func.func @transform_2(%arg0: i32) -> (i32, i32) {
    %c0_i32 = arith.constant 0 : i32
    %c0_i32_0 = arith.constant 0 : i32
    %c0_i32_1 = arith.constant 0 : i32
    return %c0_i32, %c0_i32_0 : i32, i32
  }
  func.func @transform_3(%arg0: i32) -> (i32, i32) {
    %c0_i32 = arith.constant 0 : i32
    %c0_i32_0 = arith.constant 0 : i32
    %c0_i32_1 = arith.constant 0 : i32
    return %c0_i32, %c0_i32_0 : i32, i32
  }
  func.func @transform_4(%arg0: i32) -> (i32, i32, i32) {
    %c0_i32 = arith.constant 0 : i32
    %c0_i32_0 = arith.constant 0 : i32
    %c0_i32_1 = arith.constant 0 : i32
    return %arg0, %c0_i32, %c0_i32_0 : i32, i32, i32
  }
}

</mosaic_0001>

<bundles_post_ra>
// kernel: tpu_custom_call.1
= control target key start
LH: loop header
LB: loop body
LE: loop exit
PB: predicated region body
PF: predicated region fallthrough
CT: control target
= control target key end

     0   :  { %9 = vsyncpa [#allocation3], 0  ;;  %s1114_s0 = inlined_call_operand.hbm [shape: f32[1,8,326], index: 0, kind: input, shape index: {}]   ;;  %s1115_s1 = inlined_call_operand.vmem [shape: f32[1,288], index: 1, kind: input, shape index: {}]   ;;  %s1116_s2 = inlined_call_operand.hbm [shape: f32[8,72], index: 2, kind: input, shape index: {}]   ;;  %s1117_s3 = inlined_call_operand.vmem [shape: f32[8,72], index: 3, kind: input, shape index: {}]   ;;  %s1118_s4 = inlined_call_operand.hbm [shape: f32[1,8,288], index: 4, kind: output, shape index: {}]  }
   0x1   :  { %10 = vsyncpa [#allocation6], 0 }
   0x2   :  { %11 = vsyncpa [#allocation4], 0  ;;  %s902_s15 = smov [#allocation2]   ;;  %s903_s17 = smov [#allocation5]  }
   0x3   :  { %s18_s16 = sshll.u32 %s902_s15, 4  ;;  %s30_s18 = sshll.u32 %s903_s17, 4  ;;  %s19_s16 = int_to_ptr.vmem [resolvable:$true] %s18_s16  ;;  %s31_s18 = int_to_ptr.vmem [resolvable:$true] %s30_s18 }
   0x4   :  { %s830_s21 = scalar_lea.hbm %s1114_s0, 384 }
   0x5   :  { %p831_p0 = scmp.ne.s32.totalorder %s1114_s0, %s830_s21  ;;  %p834_p1 = scmp.lt.u32.totalorder %s830_s21, %s1114_s0 }
   0x7   :  { %p836_p2 = pnand %p834_p1, %p831_p0 }
   0x9   :  { %839 = shalt.err (!%p836_p2)
}
   0xa   :  { %s840_s26 = scalar_lea.vmem %s19_s16, 384  ;;  %p845_p4 = scmp.lt.s32.totalorder %s19_s16, %s19_s16 }
   0xb   :  { %p841_p3 = scmp.ne.s32.totalorder %s19_s16, %s840_s26  ;;  %p846_p5 = scmp.lt.s32.totalorder %s840_s26, %s840_s26 }
   0xd   :  { %p847_p6 = por %p846_p5, %p845_p4 }
   0xf   :  { %p848_p7 = pnand %p847_p6, %p841_p3 }
  0x11   :  { %851 = shalt.err (!%p848_p7)
}
  0x12   :  { %21 = dma.hbm_to_vmem [thread:$0]  %s1114_s0, 384, %s19_s16, [#allocation3]  }
  0x13   :  { %s852_s5 = scalar_lea.hbm %s1116_s2, 128 }
  0x14   :  { %p853_p8 = scmp.ne.s32.totalorder %s1116_s2, %s852_s5  ;;  %p856_p9 = scmp.lt.u32.totalorder %s852_s5, %s1116_s2 }
  0x16   :  { %p858_p10 = pnand %p856_p9, %p853_p8 }
  0x18   :  { %861 = shalt.err (!%p858_p10)
}
  0x19   :  { %s862_s10 = scalar_lea.vmem %s31_s18, 128  ;;  %p867_p12 = scmp.lt.s32.totalorder %s31_s18, %s31_s18 }
  0x1a   :  { %p863_p11 = scmp.ne.s32.totalorder %s31_s18, %s862_s10  ;;  %p868_p13 = scmp.lt.s32.totalorder %s862_s10, %s862_s10 }
  0x1c   :  { %p869_p0 = por %p868_p13, %p867_p12 }
  0x1e   :  { %p870_p1 = pnand %p869_p0, %p863_p11 }
  0x20   :  { %873 = shalt.err (!%p870_p1)
}
  0x21   :  { %33 = dma.hbm_to_vmem [thread:$0]  %s1116_s2, 128, %s31_s18, [#allocation6]  }
  0x22   :  { %896 = dma.done.wait [#allocation3], 384  }
  0x23   :  { %897 = vsyncadd [#allocation3], 4294966912 }
  0x24   :  { %898 = dma.done.wait [#allocation6], 128  }
  0x25   :  { %899 = vsyncadd [#allocation6], 4294967168  ;;  %v904_v0 = vmov 0.0|0.0   ;;  %v968_v1 = vld [vmem:[#allocation2 + $0x8] sm:$0xff]  ;;  %v970_v2 = vld [vmem:[#allocation2 + $0x10] sm:$0xff]  ;;  %s905_s12 = smov 126  }
  0x26   :  { %702 = vmatprep.subr.bf16.mxu1 %v904_v0  ;;  %v765_v3 = vpack.i.bf16 %v970_v2, %v968_v1  ;;  %s906_s13 = smov 127   ;;  %v976_v4 = vld [vmem:[#allocation2] sm:$0xff]  ;;  %s907_s2 = smov 110   ;;  %v910_v5 = vmov 0.0   ;;  %vm913_vm0 = vmmov 0   ;;  %vm56_vm1 = vcmask 1039360  }
  0x27   :  { %s908_s14 = smov 108   ;;  %s909_s15 = smov 109   ;;  %214 = vmatprep.mubr.f32.mxu0 %v910_v5  ;;  %662 = vmatprep.mubr.msk.f32.mxu1 %vm913_vm0, %v910_v5  ;;  %vm80_vm2 = vcmask 900096   ;;  %vm68_vm3 = vcmask 1031168   ;;  %vm104_vm4 = vcmask 883712   ;;  %vm92_vm5 = vcmask 891904  }
  0x28   :  { %766 = vrot.lane.b32.xlu1 %v765_v3, %s905_s12  ;;  %761 = vrot.lane.b32.xlu0 %v765_v3, %s906_s13  ;;  %s911_s16 = smov 91   ;;  %s912_s17 = smov 92   ;;  %vm128_vm6 = vcmask 744448   ;;  %vm116_vm7 = vcmask 752640   ;;  %vm140_vm8 = vcmask 736256   ;;  %v46_v60 = vld [vmem:[#allocation5] sm:$0xff] }
  0x29   :  { %s914_s18 = smov 90   ;;  %vm146_vm9 = vcmask 588800   ;;  %s915_s21 = smov 19   ;;  %vm322_vm10 = vcmask 154624   ;;  %vm329_vm11 = vcmask 416768   ;;  %vm916_vm13 = vmmov 1  }
  0x2a   :  { %vm619_vm12 = vmneg %vm322_vm10 }
  0x2b   :  { %vm733_vm14 = vmpackc.low %vm916_vm13, %vm329_vm11 }
  0x2c   :  { %771 = vrot.lane.b32.xlu1 %v765_v3, %s907_s2  ;;  %50 = vrot.lane.b32.xlu0 %v976_v4, %s906_s13  ;;  %vm717_vm15 = vmpackc.low %vm916_vm13, %vm619_vm12 }
  0x30   :  { %74 = vrot.lane.b32.xlu1 %v976_v4, %s907_s2  ;;  %62 = vrot.lane.b32.xlu0 %v976_v4, %s905_s12 }
  0x34   :  { %781 = vrot.lane.b32.xlu1 %v765_v3, %s908_s14  ;;  %776 = vrot.lane.b32.xlu0 %v765_v3, %s909_s15 }
  0x38   :  { %98 = vrot.lane.b32.xlu1 %v976_v4, %s908_s14  ;;  %86 = vrot.lane.b32.xlu0 %v976_v4, %s909_s15 }
  0x3c   :  { %791 = vrot.lane.b32.xlu1 %v765_v3, %s911_s16  ;;  %786 = vrot.lane.b32.xlu0 %v765_v3, %s912_s17 }
  0x40   :  { %122 = vrot.lane.b32.xlu1 %v976_v4, %s911_s16  ;;  %110 = vrot.lane.b32.xlu0 %v976_v4, %s912_s17 }
  0x44   :  { %138 = vrot.lane.b32.xlu1 %v970_v2, %s914_s18  ;;  %136 = vrot.lane.b32.xlu0 %v968_v1, %s914_s18 }
  0x48   :  { %134 = vrot.lane.b32.xlu0 %v976_v4, %s914_s18 }
  0x9a   :  { %v767_v6 = vpop.permute.xlu1 %766  ;;  %v762_v7 = vpop.permute.xlu0 %761 }
  0x9b   :  { %v764_v8 = vunpack.i.h.bf16 %v762_v7  ;;  %v763_v9 = vunpack.i.l.bf16 %v762_v7  ;;  %v769_v10 = vunpack.i.h.bf16 %v767_v6  ;;  %v768_v11 = vunpack.i.l.bf16 %v767_v6 }
  0x9c   :  { %v295_v7 = vlaneseq }
  0x9d   :  { %v703_v12 = vpack.c.bf16 %v764_v8, %v970_v2  ;;  %v58_v13 = vsel %vm56_vm1, %v763_v9, %v764_v8  ;;  %v70_v22 = vsel %vm68_vm3, %v768_v11, %v769_v10 }
  0x9e   :  { %v772_v14 = vpop.permute.xlu1 %771  ;;  %v51_v15 = vpop.permute.xlu0 %50  ;;  %v686_v16 = vpack.c.bf16 %v58_v13, %v968_v1  ;;  %v296_v8 = vshrl.u32 %v295_v7, 7 }
  0x9f   :  { %v774_v17 = vunpack.i.h.bf16 %v772_v14  ;;  %v773_v18 = vunpack.i.l.bf16 %v772_v14  ;;  %v57_v19 = vsel %vm56_vm1, %v51_v15, %v763_v9  ;;  %704 = vmatpush3.bf16.msra.mxu1 %v703_v12 }
  0xa0   :  { %687 = vmatprep.subr.bf16.mxu0 %v686_v16  ;;  %705 = vmatprep.subr.bf16.mxu1 %v904_v0  ;;  %v688_v20 = vpack.c.bf16 %v57_v19, %v976_v4  ;;  %v305_v9 = vsub.s32 2, %v296_v8  ;;  %v301_v13 = vsub.s32 1, %v296_v8 }
  0xa1   :  { %v706_v21 = vpack.c.bf16 %v774_v17, %v769_v10  ;;  %v82_v23 = vsel %vm80_vm2, %v773_v18, %v774_v17  ;;  %v45_v10 = vld [vmem:[%s1115_s1] sm:$0x7] }
  0xa2   :  { %v75_v24 = vpop.permute.xlu1 %74  ;;  %689 = vmatpush1.bf16.msra.mxu0 %v688_v20  ;;  %v63_v25 = vpop.permute.xlu0 %62  ;;  %v690_v26 = vpack.c.bf16 %v82_v23, %v70_v22  ;;  %v302_v19 = vrot.slane %v45_v10, %v301_v13 }
  0xa3   :  { %v81_v27 = vsel %vm80_vm2, %v75_v24, %v773_v18  ;;  %v69_v28 = vsel %vm68_vm3, %v63_v25, %v768_v11  ;;  %707 = vmatpush3.bf16.msra.mxu1 %v706_v21  ;;  %v306_v11 = vrot.slane %v45_v10, %v305_v9  ;;  %v297_v18 = vsub.s32 0, %v296_v8 }
  0xa4   :  { %v692_v29 = vpack.c.bf16 %v81_v27, %v69_v28  ;;  %691 = vmatprep.subr.bf16.mxu0 %v690_v26  ;;  %708 = vmatprep.subr.bf16.mxu1 %v904_v0 }
  0xa5   :  { %v298_v23 = vrot.slane %v45_v10, %v297_v18 }
  0xa6   :  { %v782_v30 = vpop.permute.xlu1 %781  ;;  %693 = vmatpush1.bf16.msra.mxu0 %v692_v29  ;;  %v777_v31 = vpop.permute.xlu0 %776 }
  0xa7   :  { %v784_v32 = vunpack.i.h.bf16 %v782_v30  ;;  %v783_v33 = vunpack.i.l.bf16 %v782_v30  ;;  %v779_v34 = vunpack.i.h.bf16 %v777_v31  ;;  %v778_v35 = vunpack.i.l.bf16 %v777_v31 }
  0xa9   :  { %v709_v36 = vpack.c.bf16 %v784_v32, %v779_v34  ;;  %v94_v37 = vsel %vm92_vm5, %v778_v35, %v779_v34  ;;  %v106_v38 = vsel %vm104_vm4, %v783_v33, %v784_v32 }
  0xaa   :  { %v99_v39 = vpop.permute.xlu1 %98  ;;  %v87_v40 = vpop.permute.xlu0 %86  ;;  %v694_v41 = vpack.c.bf16 %v106_v38, %v94_v37 }
  0xab   :  { %v105_v42 = vsel %vm104_vm4, %v99_v39, %v783_v33  ;;  %v93_v43 = vsel %vm92_vm5, %v87_v40, %v778_v35  ;;  %710 = vmatpush3.bf16.msra.mxu1 %v709_v36 }
  0xac   :  { %v696_v44 = vpack.c.bf16 %v105_v42, %v93_v43  ;;  %695 = vmatprep.subr.bf16.mxu0 %v694_v41  ;;  %711 = vmatprep.subr.bf16.mxu1 %v904_v0 }
  0xae   :  { %v792_v45 = vpop.permute.xlu1 %791  ;;  %v787_v46 = vpop.permute.xlu0 %786  ;;  %697 = vmatpush1.bf16.msra.mxu0 %v696_v44 }
  0xaf   :  { %v794_v47 = vunpack.i.h.bf16 %v792_v45  ;;  %v793_v48 = vunpack.i.l.bf16 %v792_v45  ;;  %v789_v49 = vunpack.i.h.bf16 %v787_v46  ;;  %v788_v50 = vunpack.i.l.bf16 %v787_v46 }
  0xb1   :  { %v712_v51 = vpack.c.bf16 %v794_v47, %v789_v49  ;;  %v118_v52 = vsel %vm116_vm7, %v788_v50, %v789_v49  ;;  %v130_v53 = vsel %vm128_vm6, %v793_v48, %v794_v47 }
  0xb2   :  { %v123_v54 = vpop.permute.xlu1 %122  ;;  %v111_v55 = vpop.permute.xlu0 %110  ;;  %v698_v56 = vpack.c.bf16 %v130_v53, %v118_v52 }
  0xb3   :  { %v129_v57 = vsel %vm128_vm6, %v123_v54, %v793_v48  ;;  %v117_v58 = vsel %vm116_vm7, %v111_v55, %v788_v50  ;;  %713 = vmatpush3.bf16.msra.mxu1 %v712_v51 }
  0xb4   :  { %v700_v59 = vpack.c.bf16 %v129_v57, %v117_v58  ;;  %699 = vmatprep.subr.bf16.mxu0 %v698_v56  ;;  %660 = vmatprep.subr.mxu1 %v910_v5 }
  0xb6   :  { %v139_v61 = vpop.permute.xlu1 %138  ;;  %v137_v62 = vpop.permute.xlu0 %136  ;;  %701 = vmatpush1.bf16.msra.mxu0 %v700_v59 }
  0xb7   :  { %v142_v63 = vsel %vm140_vm8, %v137_v62, %v139_v61  ;;  %661 = vmatpush3.msra.mxu1 %v139_v61 }
  0xb8   :  { %166 = vmatprep.subr.mxu0 %v142_v63  ;;  %663 = vmatmul.mubr.msk.f32.vlgmr.msra.gmra.mrb[0].mxu1 %vm146_vm9, %v46_v60 }
  0xb9   :  { %731 = vmatprep.subr.bf16.mxu1 %v904_v0  ;;  %683 = vmatprep.mubr.msk.f32.mxu1 %vm913_vm0, %v910_v5  ;;  %vm599_vm0 = vcmask 261120  }
  0xba   :  { %v135_v3 = vpop.permute.xlu0 %134 }
  0xbb   :  { %v141_v6 = vsel %vm140_vm8, %v135_v3, %v137_v62 }
  0xbc   :  { %167 = vmatpush1.msra.mxu0 %v141_v6 }
  0xbd   :  { %617 = vmatmul.mubr.msk.f32.vlgmr.msra.gmra.mrb[0].mxu0 %vm146_vm9, %v46_v60 }
  0xbe   :  { %489 = vmatprep.mubr.f32.mxu0 %v910_v5 }
 0x18b   :  { %v287_v12 = vpop.f32.mrb[0].mxu1 }
 0x18c   :  { %v293_v14 = vmax.f32 %v287_v12, 0.0  ;;  %v664_v15 = vpop.f32.mrb[1].mxu1 }
 0x18e   :  { %v312_v16 = vmul.f32 %v306_v11, %v293_v14 }
 0x190   :  { %v216_v17 = vpop.f32.mrb[0].mxu0  ;;  %320 = vrot.lane.b32.xlu0 %v312_v16, %s915_s21 }
 0x191   :  { %v218_v20 = vpop.f32.mrb[1].mxu0  ;;  %v291_v22 = vmax.f32 %v216_v17, 0.0 }
 0x192   :  { %v292_v21 = vmax.f32 %v218_v20, 0.0 }
 0x193   :  { %v310_v25 = vmul.f32 %v298_v23, %v291_v22 }
 0x194   :  { %v311_v24 = vmul.f32 %v302_v19, %v292_v21 }
 0x196   :  { %318 = vrot.lane.b32.xlu1 %v311_v24, %s915_s21 }
 0x19a   :  { %316 = vrot.lane.b32.xlu1 %v310_v25, %s915_s21 }
 0x202   :  { %v321_v29 = vpop.permute.xlu0 %320 }
 0x208   :  { %v319_v26 = vpop.permute.xlu1 %318 }
 0x209   :  { %v324_v30 = vsel %vm322_vm10, %v319_v26, %v321_v29 }
 0x20a   :  { %v330_v32 = vsel %vm329_vm11, %v324_v30, 0.0 }
 0x20c   :  { %v317_v27 = vpop.permute.xlu1 %316 }
 0x20d   :  { %v328_v28 = vsel %vm322_vm10, 0.0, %v317_v27  ;;  %v323_v31 = vsel %vm322_vm10, %v317_v27, %v319_v26 }
 0x20e   :  { %345 = vrot.lane.b32.xlu0 %v328_v28, %s905_s12  ;;  %334 = vrot.lane.b32.xlu1 %v328_v28, %s906_s13  ;;  %v805_v33 = vpack.i.bf16 %v330_v32, %v323_v31 }
 0x212   :  { %367 = vrot.lane.b32.xlu0 %v328_v28, %s909_s15  ;;  %356 = vrot.lane.b32.xlu1 %v328_v28, %s907_s2 }
 0x216   :  { %389 = vrot.lane.b32.xlu0 %v328_v28, %s912_s17  ;;  %378 = vrot.lane.b32.xlu1 %v328_v28, %s908_s14 }
 0x21a   :  { %806 = vrot.lane.b32.xlu1 %v805_v33, %s907_s2  ;;  %796 = vrot.lane.b32.xlu0 %v805_v33, %s906_s13 }
 0x21e   :  { %816 = vrot.lane.b32.xlu1 %v805_v33, %s908_s14  ;;  %801 = vrot.lane.b32.xlu0 %v805_v33, %s905_s12 }
 0x222   :  { %826 = vrot.lane.b32.xlu1 %v805_v33, %s911_s16  ;;  %811 = vrot.lane.b32.xlu0 %v805_v33, %s909_s15 }
 0x226   :  { %400 = vrot.lane.b32.xlu1 %v328_v28, %s911_s16  ;;  %821 = vrot.lane.b32.xlu0 %v805_v33, %s912_s17  ;;  %v331_v33 = vld [vmem:[%s1117_s3] sm:$0xff]  ;;  %s917_s3 = smov [#allocation7]  }
 0x227   :  { %s607_s23 = sshll.u32 %s917_s3, 4  ;;  %s608_s23 = int_to_ptr.vmem [resolvable:$true] %s607_s23 }
 0x228   :  { %s874_s24 = scalar_lea.vmem %s608_s23, 384  ;;  %p879_p3 = scmp.lt.s32.totalorder %s608_s23, %s608_s23 }
 0x229   :  { %p875_p2 = scmp.ne.s32.totalorder %s608_s23, %s874_s24  ;;  %p880_p4 = scmp.lt.s32.totalorder %s874_s24, %s874_s24 }
 0x22a   :  { %415 = vrot.lane.b32.xlu1 %v330_v32, %s914_s18  ;;  %413 = vrot.lane.b32.xlu0 %v323_v31, %s914_s18 }
 0x22b   :  { %p881_p5 = por %p880_p4, %p879_p3 }
 0x22d   :  { %p882_p6 = pnand %p881_p5, %p875_p2 }
 0x22e   :  { %411 = vrot.lane.b32.xlu0 %v328_v28, %s914_s18 }
 0x280   :  { %v346_v34 = vpop.permute.xlu0 %345  ;;  %v335_v35 = vpop.permute.xlu1 %334 }
 0x284   :  { %v368_v36 = vpop.permute.xlu0 %367  ;;  %v357_v37 = vpop.permute.xlu1 %356 }
 0x288   :  { %v390_v38 = vpop.permute.xlu0 %389  ;;  %v379_v39 = vpop.permute.xlu1 %378 }
 0x28c   :  { %v807_v40 = vpop.permute.xlu1 %806  ;;  %v797_v41 = vpop.permute.xlu0 %796 }
 0x28d   :  { %v799_v42 = vunpack.i.h.bf16 %v797_v41  ;;  %v798_v43 = vunpack.i.l.bf16 %v797_v41  ;;  %v809_v44 = vunpack.i.h.bf16 %v807_v40  ;;  %v808_v45 = vunpack.i.l.bf16 %v807_v40 }
 0x28f   :  { %v732_v46 = vpack.c.bf16 %v799_v42, %v324_v30  ;;  %v340_v47 = vsel %vm56_vm1, %v335_v35, %v798_v43  ;;  %v341_v48 = vsel %vm56_vm1, %v798_v43, %v799_v42  ;;  %v362_v55 = vsel %vm80_vm2, %v357_v37, %v808_v45 }
 0x290   :  { %v716_v49 = vpack.c.bf16 %v340_v47, %v317_v27  ;;  %v817_v50 = vpop.permute.xlu1 %816  ;;  %v802_v51 = vpop.permute.xlu0 %801  ;;  %v714_v52 = vpack.c.bf16 %v341_v48, %v323_v31  ;;  %v363_v57 = vsel %vm80_vm2, %v808_v45, %v809_v44 }
 0x291   :  { %v804_v53 = vunpack.i.h.bf16 %v802_v51  ;;  %v803_v54 = vunpack.i.l.bf16 %v802_v51  ;;  %734 = vmatpush3.bf16.msk.msra.mxu1 %vm733_vm14, %v732_v46  ;;  %v818_v56 = vunpack.i.l.bf16 %v817_v50  ;;  %v819_v58 = vunpack.i.h.bf16 %v817_v50 }
 0x292   :  { %715 = vmatprep.subr.bf16.mxu0 %v714_v52  ;;  %735 = vmatprep.subr.bf16.mxu1 %v904_v0 }
 0x293   :  { %v736_v59 = vpack.c.bf16 %v809_v44, %v804_v53  ;;  %v351_v60 = vsel %vm68_vm3, %v346_v34, %v803_v54  ;;  %718 = vmatpush1.bf16.msk.msra.mxu0 %vm717_vm15, %v716_v49  ;;  %v352_v61 = vsel %vm68_vm3, %v803_v54, %v804_v53  ;;  %v384_v9 = vsel %vm104_vm4, %v379_v39, %v818_v56 }
 0x294   :  { %v721_v62 = vpack.c.bf16 %v362_v55, %v351_v60  ;;  %v827_v63 = vpop.permute.xlu1 %826  ;;  %v812_v3 = vpop.permute.xlu0 %811  ;;  %v719_v6 = vpack.c.bf16 %v363_v57, %v352_v61  ;;  %v385_v15 = vsel %vm104_vm4, %v818_v56, %v819_v58 }
 0x295   :  { %v814_v7 = vunpack.i.h.bf16 %v812_v3  ;;  %v813_v8 = vunpack.i.l.bf16 %v812_v3  ;;  %737 = vmatpush3.bf16.msra.mxu1 %v736_v59  ;;  %v829_v10 = vunpack.i.h.bf16 %v827_v63  ;;  %v828_v11 = vunpack.i.l.bf16 %v827_v63 }
 0x296   :  { %720 = vmatprep.subr.bf16.mxu0 %v719_v6  ;;  %738 = vmatprep.subr.bf16.mxu1 %v904_v0 }
 0x297   :  { %v739_v12 = vpack.c.bf16 %v819_v58, %v814_v7  ;;  %v373_v13 = vsel %vm92_vm5, %v368_v36, %v813_v8  ;;  %722 = vmatpush1.bf16.msra.mxu0 %v721_v62  ;;  %v374_v14 = vsel %vm92_vm5, %v813_v8, %v814_v7  ;;  %v407_v22 = vsel %vm128_vm6, %v828_v11, %v829_v10 }
 0x298   :  { %v725_v16 = vpack.c.bf16 %v384_v9, %v373_v13  ;;  %v401_v17 = vpop.permute.xlu1 %400  ;;  %v822_v18 = vpop.permute.xlu0 %821  ;;  %v723_v19 = vpack.c.bf16 %v385_v15, %v374_v14 }
 0x299   :  { %v824_v20 = vunpack.i.h.bf16 %v822_v18  ;;  %v823_v21 = vunpack.i.l.bf16 %v822_v18  ;;  %740 = vmatpush3.bf16.msra.mxu1 %v739_v12  ;;  %v406_v23 = vsel %vm128_vm6, %v401_v17, %v828_v11 }
 0x29a   :  { %724 = vmatprep.subr.bf16.mxu0 %v723_v19  ;;  %741 = vmatprep.subr.bf16.mxu1 %v904_v0 }
 0x29b   :  { %v742_v24 = vpack.c.bf16 %v829_v10, %v824_v20  ;;  %v395_v25 = vsel %vm116_vm7, %v390_v38, %v823_v21  ;;  %726 = vmatpush1.bf16.msra.mxu0 %v725_v16  ;;  %v396_v26 = vsel %vm116_vm7, %v823_v21, %v824_v20 }
 0x29c   :  { %v729_v27 = vpack.c.bf16 %v406_v23, %v395_v25  ;;  %v416_v28 = vpop.permute.xlu1 %415  ;;  %v414_v29 = vpop.permute.xlu0 %413  ;;  %v727_v30 = vpack.c.bf16 %v407_v22, %v396_v26 }
 0x29d   :  { %743 = vmatpush3.bf16.msra.mxu1 %v742_v24  ;;  %v418_v0 = vsel %vm140_vm8, %v414_v29, %v416_v28 }
 0x29e   :  { %728 = vmatprep.subr.bf16.mxu0 %v727_v30  ;;  %681 = vmatprep.subr.mxu1 %v910_v5 }
 0x29f   :  { %730 = vmatpush1.bf16.msra.mxu0 %v729_v27 }
 0x2a0   :  { %v412_v31 = vpop.permute.xlu0 %411  ;;  %441 = vmatprep.subr.mxu0 %v418_v0 }
 0x2a1   :  { %v417_v32 = vsel %vm140_vm8, %v412_v31, %v414_v29  ;;  %682 = vmatpush3.msra.mxu1 %v416_v28 }
 0x2a2   :  { %684 = vmatmul.mubr.msk.f32.vlgmr.msra.gmra.mrb[2].mxu1 %vm146_vm9, %v331_v33 }
 0x2a3   :  { %442 = vmatpush1.msra.mxu0 %v417_v32 }
 0x2a4   :  { %621 = vmatmul.mubr.msk.f32.vlgmr.msra.gmra.mrb[2].mxu0 %vm146_vm9, %v331_v33 }
 0x375   :  { %v562_v34 = vpop.f32.mrb[2].mxu1 }
 0x376   :  { %v685_v35 = vpop.f32.mrb[3].mxu1 }
 0x377   :  { %v491_v5 = vpop.f32.mrb[2].mxu0 }
 0x378   :  { %569 = vrot.lane.b32.xlu1 %v491_v5, %s915_s21  ;;  %v493_v36 = vpop.f32.mrb[3].mxu0 }
 0x379   :  { %571 = vrot.lane.b32.xlu0 %v493_v36, %s915_s21 }
 0x37c   :  { %573 = vrot.lane.b32.xlu1 %v562_v34, %s915_s21 }
 0x3ea   :  { %v570_v37 = vpop.permute.xlu1 %569 }
 0x3eb   :  { %v580_v38 = vadd.f32 %v570_v37, %v976_v4  ;;  %v572_v39 = vpop.permute.xlu0 %571 }
 0x3ec   :  { %v575_v40 = vsel %vm322_vm10, %v570_v37, %v572_v39 }
 0x3ed   :  { %v581_v41 = vadd.f32 %v575_v40, %v968_v1  ;;  %586 = vrot.lane.b32.xlu0 %v580_v38, %s909_s15 }
 0x3ee   :  { %v574_v42 = vpop.permute.xlu1 %573 }
 0x3ef   :  { %v576_v43 = vsel %vm322_vm10, %v572_v39, %v574_v42  ;;  %588 = vrot.lane.b32.xlu1 %v581_v41, %s909_s15 }
 0x3f0   :  { %v582_v44 = vadd.f32 %v576_v43, %v970_v2 }
 0x3f2   :  { %590 = vrot.lane.b32.xlu0 %v582_v44, %s909_s15 }
 0x45f   :  { %v587_v45 = vpop.permute.xlu0 %586 }
 0x461   :  { %v589_v46 = vpop.permute.xlu1 %588 }
 0x462   :  { %v592_v4 = vsel %vm92_vm5, %v587_v45, %v589_v46 }
 0x463   :  { %597 = vst [vmem:[#allocation7] sm:$0xff] %v592_v4 }
 0x464   :  { %v591_v1 = vpop.permute.xlu0 %590 }
 0x465   :  { %v593_v47 = vsel %vm92_vm5, %v589_v46, %v591_v1  ;;  %600 = vst.msk [vmem:[#allocation7 + $0x10] sm:$0xff] %vm599_vm0, %v591_v1 }
 0x466   :  { %598 = vst [vmem:[#allocation7 + $0x8] sm:$0xff] %v593_v47 }
 0x467   :  { %885 = shalt.err (!%p882_p6)
}
 0x468   :  { %s886_s27 = scalar_lea.hbm %s1118_s4, 384 }
 0x469   :  { %p887_p7 = scmp.ne.s32.totalorder %s1118_s4, %s886_s27  ;;  %p890_p8 = scmp.lt.u32.totalorder %s886_s27, %s1118_s4 }
 0x46b   :  { %p892_p9 = pnand %p890_p8, %p887_p7 }
 0x46d   :  { %895 = shalt.err (!%p892_p9)
}
 0x46e   :  { %610 = dma.vmem_to_hbm [thread:$0]  %s608_s23, 384, %s1118_s4, [#allocation4]  }
 0x46f   :  { %900 = dma.done.wait [#allocation4], 384  }
 0x470   :  { %901 = vsyncadd [#allocation4], 4294966912 }
 0x471   :  { %614 = vsyncpa [#allocation3], 1 }
 0x472   :  { %615 = vsyncpa [#allocation6], 1 }
 0x473   :  { %616 = vsyncpa [#allocation4], 1 }

</bundles_post_ra>
